<compile_context>
chip_gen: v6e
topology: v6e:2x2x1
jax: 0.10.0
libtpu: 0.0.40
codegen_flags: <defaults>
</compile_context>

<pallas_src>
import jax
import jax.numpy as jnp
from jax.experimental import pallas as pl
from jax.experimental.pallas import tpu as pltpu


_TARGET_TILE_BYTES = 2 * 1024 * 1024          # ~2 MiB per block
_LANE_CANDIDATES = (2048, 1024, 512, 256, 128)  # lane-dense last-dim widths
_SUBLANE = {4: 8, 2: 16, 1: 32}               # sublane packing per itemsize


def _exp_kernel(x_ref, o_ref):
    # Elementwise exp on the current VMEM tile (EUP transcendental path).
    o_ref[...] = jnp.exp(x_ref[...])


@jax.jit
def pallas_exp(x: jax.Array) -> jax.Array:
    """Elementwise exp via a Pallas TPU kernel. Matches torch.exp semantics."""
    orig_shape = x.shape

    # torch.exp promotes integer/bool inputs to floating point.
    if not jnp.issubdtype(x.dtype, jnp.floating):
        x = x.astype(jnp.float32)
    # TODO(synk): complex dtypes (supported by torch.exp) are not implemented.
    dtype = x.dtype
    itemsize = jnp.dtype(dtype).itemsize
    sub = _SUBLANE.get(itemsize, 8)

    flat = x.reshape(-1)
    n = flat.shape[0]
    if n == 0:
        return flat.reshape(orig_shape)

    # ---- lane-dense 2-D view (rows, C) --------------------------------------
    # Widest C (multiple of 128) that requires no padding; aligned inputs get a
    # zero-copy fast path. Misaligned sizes fall back to C=128 + minimal pad.
    C = None
    for cand in _LANE_CANDIDATES:
        if n % (cand * sub) == 0:
            C = cand
            break
    if C is None:
        C = 128
    gran = C * sub
    pad = (-n) % gran
    if pad:  # only misaligned sizes pay for pad (+ trailing slice)
        flat = jnp.pad(flat, (0, pad))
    rows = (n + pad) // C

    # ---- tile size: ~2 MiB per block, multiple of the sublane packing --------
    target_rows = max(sub, (_TARGET_TILE_BYTES // (C * itemsize)) // sub * sub)
    tile_rows = min(rows, target_rows)
    # Prefer an exact divisor of `rows` (avoids a masked partial trailing
    # block) as long as it stays within ~half the target tile size.
    if rows % tile_rows:
        t = tile_rows
        floor = max(sub, tile_rows // 2)
        while t > floor and rows % t:
            t -= sub
        if rows % t == 0:
            tile_rows = t
    num_steps = pl.cdiv(rows, tile_rows)

    block = (tile_rows, C)
    if num_steps >= 4:
        # Deeper input pipelining helps v7x hide the fixed per-step latency.
        in_spec = pl.BlockSpec(block, lambda i: (i, 0),
                               pipeline_mode=pl.Buffered(3))
    else:
        in_spec = pl.BlockSpec(block, lambda i: (i, 0))
    out_spec = pl.BlockSpec(block, lambda i: (i, 0))

    out2d = pl.pallas_call(
        _exp_kernel,
        out_shape=jax.ShapeDtypeStruct((rows, C), dtype),
        grid_spec=pltpu.PrefetchScalarGridSpec(
            num_scalar_prefetch=0,
            grid=(num_steps,),
            in_specs=[in_spec],
            out_specs=out_spec,
        ),
        compiler_params=pltpu.CompilerParams(
            dimension_semantics=("parallel",),
        ),
        cost_estimate=pl.CostEstimate(
            flops=0,
            transcendentals=n,
            bytes_accessed=2 * n * itemsize,
        ),
    )(flat.reshape(rows, C))

    out_flat = out2d.reshape(-1)
    if pad:
        out_flat = out_flat[:n]
    return out_flat.reshape(orig_shape)


if __name__ == "__main__":
    key = jax.random.PRNGKey(0)
    k1, k2, k3 = jax.random.split(key, 3)

    # Primary small NCHW-shaped input consistent with a typical forward call.
    x = jax.random.normal(key, (2, 4, 16, 16), dtype=jnp.float32)
    out = pallas_exp(x)
    jax.block_until_ready(out)
    ref = jnp.exp(x)
    assert out.shape == x.shape and out.dtype == x.dtype
    assert jnp.allclose(out, ref, rtol=1e-6, atol=1e-6)

    # Larger aligned input: wide lane layout, multi-step grid, Buffered(3).
    xl = jax.random.normal(k1, (8, 64, 64, 64), dtype=jnp.float32)
    ol = pallas_exp(xl)
    jax.block_until_ready(ol)
    assert jnp.allclose(ol, jnp.exp(xl), rtol=1e-6, atol=1e-6)

    # Misaligned size -> minimal pad + slice path.
    xm = jax.random.normal(k2, (1000, 7), dtype=jnp.float32)
    om = pallas_exp(xm)
    jax.block_until_ready(om)
    assert jnp.allclose(om, jnp.exp(xm), rtol=1e-6, atol=1e-6)

    # bf16 path (16-row sublane packing).
    xb = jax.random.normal(k3, (2, 4, 16, 16), dtype=jnp.bfloat16)
    ob = pallas_exp(xb)
    jax.block_until_ready(ob)
    assert ob.dtype == jnp.bfloat16
    assert jnp.allclose(ob.astype(jnp.float32),
                        jnp.exp(xb).astype(jnp.float32), rtol=2e-2, atol=2e-2)

    # Integer input promotes to float32 (torch.exp semantics).
    xi = jnp.arange(-8, 8, dtype=jnp.int32).reshape(4, 4)
    oi = pallas_exp(xi)
    jax.block_until_ready(oi)
    assert oi.dtype == jnp.float32
    assert jnp.allclose(oi, jnp.exp(xi.astype(jnp.float32)), rtol=1e-6, atol=1e-6)

    print("KERNEL_OK")
</pallas_src>

<mosaic_0001>
module attributes {stable_mosaic.version = 11 : i64} {
  func.func @_exp_kernel(%arg0: i32, %arg1: memref<8x256xf32, #tpu.memory_space<vmem>>, %arg2: memref<8x256xf32, #tpu.memory_space<vmem>>) attributes {dimension_semantics = [#tpu.dimension_semantics<parallel>], iteration_bounds = array<i64: 1>, scalar_prefetch = 0 : i64, scratch_operands = 0 : i64, tpu.core_type = #tpu.core_type<tc>, window_params = [{transform_indices = @transform_0, window_bounds = array<i64: 8, 256>}, {transform_indices = @transform_1, window_bounds = array<i64: 8, 256>}]} {
    %c0 = arith.constant 0 : index
    %c0_0 = arith.constant 0 : index
    %0 = vector.load %arg1[%c0, %c0_0] : memref<8x256xf32, #tpu.memory_space<vmem>>, vector<8x256xf32>
    %1 = math.exp %0 : vector<8x256xf32>
    %c0_1 = arith.constant 0 : index
    %c0_2 = arith.constant 0 : index
    %2 = vector.load %arg2[%c0_1, %c0_2] : memref<8x256xf32, #tpu.memory_space<vmem>>, vector<8x256xf32>
    tpu.vector_store %arg2[%c0_1, %c0_2], %1 {strides = array<i32>} : memref<8x256xf32, #tpu.memory_space<vmem>>, vector<8x256xf32>,
    return
  }
  func.func @transform_0(%arg0: i32) -> (i32, i32) {
    %c0_i32 = arith.constant 0 : i32
    %c0_i32_0 = arith.constant 0 : i32
    return %arg0, %c0_i32 : i32, i32
  }
  func.func @transform_1(%arg0: i32) -> (i32, i32) {
    %c0_i32 = arith.constant 0 : i32
    %c0_i32_0 = arith.constant 0 : i32
    return %arg0, %c0_i32 : i32, i32
  }
}

</mosaic_0001>

<bundles_post_ra>
// kernel: pallas_exp.1
= control target key start
LH: loop header
LB: loop body
LE: loop exit
PB: predicated region body
PF: predicated region fallthrough
CT: control target
= control target key end

     0   :  { %s46_s0 = inlined_call_operand.vmem [shape: f32[8,256], index: 0, kind: input, shape index: {}]   ;;  %s47_s1 = inlined_call_operand.vmem [shape: f32[8,256], index: 1, kind: output, shape index: {}]  }
   0x1   :  { %v8_v0 = vld [vmem:[%s46_s0] sm:$0xff]  ;;  %v9_v1 = vld [vmem:[%s46_s0 + $0x8] sm:$0xff] }
   0x2   :  { %v10_v2 = vmul.f32 1.442695, %v8_v0  ;;  %v12_v3 = vmul.f32 1.442695, %v9_v1 }
   0x4   :  { %20 = vpow2.f32 %v10_v2 }
   0x5   :  { %22 = vpow2.f32 %v12_v3 }
  0x11   :  { %v21_v4 = vpop.eup %20 }
  0x12   :  { %v23_v5 = vpop.eup %22  ;;  %14 = vst [vmem:[%s47_s1] sm:$0xff] %v21_v4 }
  0x13   :  { %15 = vst [vmem:[%s47_s1 + $0x8] sm:$0xff] %v23_v5 }

</bundles_post_ra>
